<compile_context>
chip_gen: v7x
topology: tpu7x:2x2x1
jax: 0.10.0
libtpu: 0.0.40
codegen_flags: <defaults>
</compile_context>

<pallas_src>
import functools

import jax
import jax.numpy as jnp
from jax.experimental import pallas as pl
from jax.experimental.pallas import tpu as pltpu

NUM_BLOCKS = 8


def _neuron_block_kernel(x_ref, w1_ref, b1_ref, w2_ref, b2_ref, w3_ref, b3_ref,
                         w4t_ref, b4_ref, out_ref, h1_ref, acc_ref):
    b = pl.program_id(0)          # which MLP block
    j = pl.program_id(1)          # K/N tile index within the block
    nt = pl.num_programs(1)

    # ---- seed the inter-block carry (out_ref) with the model input ---------
    @pl.when((b == 0) & (j == 0))
    def _():
        out_ref[...] = x_ref[...]

    # ---- start of block: Linear(4 -> H) + ReLU into h1, zero the h3 acc ----
    @pl.when(j == 0)
    def _():
        xin = out_ref[...].astype(jnp.bfloat16)               # (B, in_f)
        h1 = jnp.dot(xin, w1_ref[0], preferred_element_type=jnp.float32)
        h1_ref[...] = jnp.maximum(h1 + b1_ref[0], 0.0)        # (B, H) f32
        acc_ref[...] = jnp.zeros_like(acc_ref)

    # ---- fused tile j:  h2_j = relu(h1 @ W2[:, j] + b2[j]);  acc += h2_j @ W3[j] ----
    h1 = h1_ref[...].astype(jnp.bfloat16)                     # (B, H)
    h2_j = jnp.dot(h1, w2_ref[0], preferred_element_type=jnp.float32)   # (B, T)
    h2_j = jnp.maximum(h2_j + b2_ref[0], 0.0).astype(jnp.bfloat16)
    acc_ref[...] += jnp.dot(h2_j, w3_ref[0],
                            preferred_element_type=jnp.float32)         # (B, H)

    # ---- end of block: bias+ReLU, Linear(H -> out_f), write the carry ------
    @pl.when(j == nt - 1)
    def _():
        h3 = jnp.maximum(acc_ref[...] + b3_ref[0], 0.0).astype(jnp.bfloat16)
        y = jax.lax.dot_general(                              # h3 @ W4 (W4 stored transposed)
            h3, w4t_ref[0],
            dimension_numbers=(((1,), (1,)), ((), ())),
            preferred_element_type=jnp.float32)               # (B, out_f)
        out_ref[...] = y + b4_ref[0]                          # nn.Identity() is a no-op


def _auto_tile(hidden):
    """Largest 128-multiple tile dividing `hidden`, ~8 MiB bf16 per weight tile."""
    if hidden % 128 != 0 or hidden <= 1024:
        return hidden
    t = (8 << 20) // (2 * hidden)
    t = max(256, min(hidden, t))
    t = (t // 128) * 128
    while hidden % t != 0:
        t -= 128
    return max(t, 128)


@functools.partial(jax.jit, static_argnames=("tile",))
def neuron_model_forward(x, params, tile=None):
    """x: (B, input_size) f32.  params: dict of stacked per-block weights (bf16 W, f32 b)."""
    B, in_f = x.shape
    w1, b1 = params["w1"], params["b1"]
    w2, b2 = params["w2"], params["b2"]
    w3, b3 = params["w3"], params["b3"]
    w4t, b4 = params["w4t"], params["b4"]
    H = w1.shape[-1]
    out_f = w4t.shape[1]
    assert in_f == out_f, "chained blocks require input_size == output_size"

    T = _auto_tile(H) if tile is None else int(tile)
    assert H % T == 0, "tile must divide hidden_size"
    assert T == H or T % 128 == 0, "partial tiles must be lane-aligned (multiple of 128)"
    nt = H // T

    in_specs = [
        pl.BlockSpec((B, in_f),      lambda b, j: (0, 0)),          # x
        pl.BlockSpec((1, in_f, H),   lambda b, j: (b, 0, 0)),       # w1
        pl.BlockSpec((1, 1, H),      lambda b, j: (b, 0, 0)),       # b1
        pl.BlockSpec((1, H, T),      lambda b, j: (b, 0, j)),       # W2 column tile j
        pl.BlockSpec((1, 1, T),      lambda b, j: (b, 0, j)),       # b2 tile j
        pl.BlockSpec((1, T, H),      lambda b, j: (b, j, 0)),       # W3 row tile j
        pl.BlockSpec((1, 1, H),      lambda b, j: (b, 0, 0)),       # b3
        pl.BlockSpec((1, out_f, H),  lambda b, j: (b, 0, 0)),       # w4 (transposed)
        pl.BlockSpec((1, 1, out_f),  lambda b, j: (b, 0, 0)),       # b4
    ]
    out_specs = pl.BlockSpec((B, out_f), lambda b, j: (0, 0))       # resident carry

    scratch_shapes = [
        pltpu.VMEM((B, H), jnp.float32),    # h1
        pltpu.VMEM((B, H), jnp.float32),    # f32 accumulator for h3
    ]

    # Explicit scoped-VMEM budget: 2x (double-buffered per-step blocks) + scratch + slack.
    step_bytes = (
        B * in_f * 4 + B * out_f * 4
        + in_f * H * 2 + H * 4
        + H * T * 2 + T * 4
        + T * H * 2 + H * 4
        + out_f * H * 2 + out_f * 4)
    scratch_bytes = 2 * B * H * 4
    vmem_limit = int(min(56 << 20, max(32 << 20,
                                       2 * step_bytes + scratch_bytes + (4 << 20))))

    grid_spec = pltpu.PrefetchScalarGridSpec(
        num_scalar_prefetch=0,
        grid=(NUM_BLOCKS, nt),
        in_specs=in_specs,
        out_specs=out_specs,
        scratch_shapes=scratch_shapes,
    )

    return pl.pallas_call(
        _neuron_block_kernel,
        out_shape=jax.ShapeDtypeStruct((B, out_f), jnp.float32),
        grid_spec=grid_spec,
        compiler_params=pltpu.CompilerParams(
            # Both axes carry serial state (block chain / K accumulation) ->
            # arbitrary.  Weight streaming is the bottleneck; do not shard.
            dimension_semantics=("arbitrary", "arbitrary"),
            vmem_limit_bytes=vmem_limit),
    )(x, w1, b1, w2, b2, w3, b3, w4t, b4)


def init_params(key, input_size, hidden_size, output_size, num_blocks=NUM_BLOCKS):
    """PyTorch-style U(-1/sqrt(fan_in), 1/sqrt(fan_in)) init, stacked per block.
    Weights stored bf16 (streamed), biases f32. W4 stored transposed (out, H)."""
    def linear(k, fan_in, fan_out):
        kw, kb = jax.random.split(k)
        bound = 1.0 / (fan_in ** 0.5)
        w = jax.random.uniform(kw, (num_blocks, fan_in, fan_out), jnp.float32, -bound, bound)
        b = jax.random.uniform(kb, (num_blocks, 1, fan_out), jnp.float32, -bound, bound)
        return w, b

    k1, k2, k3, k4 = jax.random.split(key, 4)
    w1, b1 = linear(k1, input_size, hidden_size)
    w2, b2 = linear(k2, hidden_size, hidden_size)
    w3, b3 = linear(k3, hidden_size, hidden_size)
    w4, b4 = linear(k4, hidden_size, output_size)
    return dict(
        w1=w1.astype(jnp.bfloat16), b1=b1,
        w2=w2.astype(jnp.bfloat16), b2=b2,
        w3=w3.astype(jnp.bfloat16), b3=b3,
        w4t=jnp.swapaxes(w4, 1, 2).astype(jnp.bfloat16),   # (num_blocks, out_f, H)
        b4=b4,
    )


def reference_forward(x, params):
    """Pure-JAX reference with the same numerics (bf16 matmul inputs, f32 accumulate)."""
    def lin(a, w, bias):
        return jnp.dot(a.astype(jnp.bfloat16), w,
                       preferred_element_type=jnp.float32) + bias

    h = x
    for i in range(NUM_BLOCKS):
        a = jnp.maximum(lin(h, params["w1"][i], params["b1"][i]), 0.0)
        a = jnp.maximum(lin(a, params["w2"][i], params["b2"][i]), 0.0)
        a = jnp.maximum(lin(a, params["w3"][i], params["b3"][i]), 0.0)
        h = jax.lax.dot_general(a.astype(jnp.bfloat16), params["w4t"][i],
                                dimension_numbers=(((1,), (1,)), ((), ())),
                                preferred_element_type=jnp.float32) + params["b4"][i]
    return h


if __name__ == "__main__":
    # Small shapes consistent with the module: input_size=output_size=4,
    # hidden kept small (512) for the test; the module default is 4096.
    INPUT_SIZE = 4
    HIDDEN_SIZE = 512
    OUTPUT_SIZE = 4
    BATCH = 8

    key = jax.random.PRNGKey(0)
    kx, kp = jax.random.split(key)
    x = jax.random.normal(kx, (BATCH, INPUT_SIZE), jnp.float32)
    params = init_params(kp, INPUT_SIZE, HIDDEN_SIZE, OUTPUT_SIZE)

    ref = reference_forward(x, params)

    # Multi-tile path (H // T = 4) — exercises the H=4096-capable tiling.
    out_tiled = jax.block_until_ready(neuron_model_forward(x, params, tile=128))
    # Auto tile (single tile at H=512).
    out_auto = jax.block_until_ready(neuron_model_forward(x, params))

    assert out_tiled.shape == (BATCH, OUTPUT_SIZE)
    assert jnp.allclose(out_tiled, ref, atol=2e-2, rtol=2e-2)
    assert jnp.allclose(out_auto, ref, atol=2e-2, rtol=2e-2)
    assert jnp.allclose(out_auto, out_tiled, atol=2e-2, rtol=2e-2)

    print("KERNEL_OK")
</pallas_src>

<mosaic_0001>
module attributes {stable_mosaic.version = 11 : i64} {
  func.func @_neuron_block_kernel(%arg0: i32, %arg1: i32, %arg2: memref<8x4xf32, #tpu.memory_space<vmem>>, %arg3: memref<1x4x512xbf16, #tpu.memory_space<vmem>>, %arg4: memref<1x1x512xf32, #tpu.memory_space<vmem>>, %arg5: memref<1x512x128xbf16, #tpu.memory_space<vmem>>, %arg6: memref<1x1x128xf32, #tpu.memory_space<vmem>>, %arg7: memref<1x128x512xbf16, #tpu.memory_space<vmem>>, %arg8: memref<1x1x512xf32, #tpu.memory_space<vmem>>, %arg9: memref<1x4x512xbf16, #tpu.memory_space<vmem>>, %arg10: memref<1x1x4xf32, #tpu.memory_space<vmem>>, %arg11: memref<8x4xf32, #tpu.memory_space<vmem>>, %arg12: memref<8x512xf32, #tpu.memory_space<vmem>>, %arg13: memref<8x512xf32, #tpu.memory_space<vmem>>) attributes {dimension_semantics = [#tpu.dimension_semantics<arbitrary>, #tpu.dimension_semantics<arbitrary>], iteration_bounds = array<i64: 8, 4>, scalar_prefetch = 0 : i64, scratch_operands = 2 : i64, tpu.core_type = #tpu.core_type<tc>, window_params = [{pipeline_mode = #tpu.pipeline_mode<synchronous>, transform_indices = @transform_0, window_bounds = array<i64: 8, 4>}, {transform_indices = @transform_1, window_bounds = array<i64: 1, 4, 512>}, {transform_indices = @transform_2, window_bounds = array<i64: 1, 1, 512>}, {transform_indices = @transform_3, window_bounds = array<i64: 1, 512, 128>}, {transform_indices = @transform_4, window_bounds = array<i64: 1, 1, 128>}, {transform_indices = @transform_5, window_bounds = array<i64: 1, 128, 512>}, {transform_indices = @transform_6, window_bounds = array<i64: 1, 1, 512>}, {transform_indices = @transform_7, window_bounds = array<i64: 1, 4, 512>}, {transform_indices = @transform_8, window_bounds = array<i64: 1, 1, 4>}, {pipeline_mode = #tpu.pipeline_mode<synchronous>, transform_indices = @transform_9, window_bounds = array<i64: 8, 4>}]} {
    %c0_i32 = arith.constant 0 : i32
    %0 = arith.cmpi eq, %arg0, %c0_i32 : i32
    %c0_i32_0 = arith.constant 0 : i32
    %1 = arith.cmpi eq, %arg1, %c0_i32_0 : i32
    %2 = arith.andi %0, %1 : i1
    %3 = arith.extui %2 : i1 to i32
    %c0_i32_1 = arith.constant 0 : i32
    %4 = arith.cmpi ne, %3, %c0_i32_1 : i32
    scf.if %4 {
      %c0_21 = arith.constant 0 : index
      %c0_22 = arith.constant 0 : index
      %29 = vector.load %arg2[%c0_21, %c0_22] : memref<8x4xf32, #tpu.memory_space<vmem>>, vector<8x4xf32>
      %c0_23 = arith.constant 0 : index
      %c0_24 = arith.constant 0 : index
      %30 = vector.load %arg11[%c0_23, %c0_24] : memref<8x4xf32, #tpu.memory_space<vmem>>, vector<8x4xf32>
      tpu.vector_store %arg11[%c0_23, %c0_24], %29 {strides = array<i32>} : memref<8x4xf32, #tpu.memory_space<vmem>>, vector<8x4xf32>,
    } else {
    }
    %c0_i32_2 = arith.constant 0 : i32
    %5 = arith.cmpi eq, %arg1, %c0_i32_2 : i32
    %6 = arith.extui %5 : i1 to i32
    %c0_i32_3 = arith.constant 0 : i32
    %7 = arith.cmpi ne, %6, %c0_i32_3 : i32
    scf.if %7 {
      %c0_21 = arith.constant 0 : index
      %c0_22 = arith.constant 0 : index
      %29 = vector.load %arg11[%c0_21, %c0_22] : memref<8x4xf32, #tpu.memory_space<vmem>>, vector<8x4xf32>
      %30 = arith.truncf %29 : vector<8x4xf32> to vector<8x4xbf16>
      %c0_23 = arith.constant 0 : index
      %c0_24 = arith.constant 0 : index
      %c0_25 = arith.constant 0 : index
      %31 = vector.load %arg3[%c0_23, %c0_24, %c0_25] : memref<1x4x512xbf16, #tpu.memory_space<vmem>>, vector<1x4x512xbf16>
      %32 = vector.shape_cast %31 : vector<1x4x512xbf16> to vector<4x512xbf16>
      %cst_26 = arith.constant dense<0.000000e+00> : vector<8x512xf32>
      %33 = tpu.matmul %30, %32, %cst_26 {dimension_numbers = #tpu.dot_dimension_numbers<[1], [0], [0], [1], [0, 0, 1, 1], [], []>} : vector<8x4xbf16>, vector<4x512xbf16>, vector<8x512xf32> -> vector<8x512xf32>
      %c0_27 = arith.constant 0 : index
      %c0_28 = arith.constant 0 : index
      %c0_29 = arith.constant 0 : index
      %34 = vector.load %arg4[%c0_27, %c0_28, %c0_29] : memref<1x1x512xf32, #tpu.memory_space<vmem>>, vector<1x1x512xf32>
      %35 = vector.shape_cast %34 : vector<1x1x512xf32> to vector<1x512xf32>
      %36 = vector.broadcast %35 : vector<1x512xf32> to vector<8x512xf32>
      %37 = arith.addf %33, %36 : vector<8x512xf32>
      %cst_30 = arith.constant 0.000000e+00 : f32
      %38 = vector.broadcast %cst_30 : f32 to vector<8x512xf32>
      %39 = arith.maximumf %37, %38 : vector<8x512xf32>
      %c0_31 = arith.constant 0 : index
      %c0_32 = arith.constant 0 : index
      %40 = vector.load %arg12[%c0_31, %c0_32] : memref<8x512xf32, #tpu.memory_space<vmem>>, vector<8x512xf32>
      tpu.vector_store %arg12[%c0_31, %c0_32], %39 {strides = array<i32>} : memref<8x512xf32, #tpu.memory_space<vmem>>, vector<8x512xf32>,
      %cst_33 = arith.constant 0.000000e+00 : f32
      %41 = vector.broadcast %cst_33 : f32 to vector<8x512xf32>
      %c0_34 = arith.constant 0 : index
      %c0_35 = arith.constant 0 : index
      %42 = vector.load %arg13[%c0_34, %c0_35] : memref<8x512xf32, #tpu.memory_space<vmem>>, vector<8x512xf32>
      tpu.vector_store %arg13[%c0_34, %c0_35], %41 {strides = array<i32>} : memref<8x512xf32, #tpu.memory_space<vmem>>, vector<8x512xf32>,
    } else {
    }
    %c0 = arith.constant 0 : index
    %c0_4 = arith.constant 0 : index
    %8 = vector.load %arg12[%c0, %c0_4] : memref<8x512xf32, #tpu.memory_space<vmem>>, vector<8x512xf32>
    %9 = arith.truncf %8 : vector<8x512xf32> to vector<8x512xbf16>
    %c0_5 = arith.constant 0 : index
    %c0_6 = arith.constant 0 : index
    %c0_7 = arith.constant 0 : index
    %10 = vector.load %arg5[%c0_5, %c0_6, %c0_7] : memref<1x512x128xbf16, #tpu.memory_space<vmem>>, vector<1x512x128xbf16>
    %11 = vector.shape_cast %10 : vector<1x512x128xbf16> to vector<512x128xbf16>
    %cst = arith.constant dense<0.000000e+00> : vector<8x128xf32>
    %12 = tpu.matmul %9, %11, %cst {dimension_numbers = #tpu.dot_dimension_numbers<[1], [0], [0], [1], [0, 0, 1, 1], [], []>} : vector<8x512xbf16>, vector<512x128xbf16>, vector<8x128xf32> -> vector<8x128xf32>
    %c0_8 = arith.constant 0 : index
    %c0_9 = arith.constant 0 : index
    %c0_10 = arith.constant 0 : index
    %13 = vector.load %arg6[%c0_8, %c0_9, %c0_10] : memref<1x1x128xf32, #tpu.memory_space<vmem>>, vector<1x1x128xf32>
    %14 = vector.shape_cast %13 : vector<1x1x128xf32> to vector<1x128xf32>
    %15 = vector.broadcast %14 : vector<1x128xf32> to vector<8x128xf32>
    %16 = arith.addf %12, %15 : vector<8x128xf32>
    %cst_11 = arith.constant 0.000000e+00 : f32
    %17 = vector.broadcast %cst_11 : f32 to vector<8x128xf32>
    %18 = arith.maximumf %16, %17 : vector<8x128xf32>
    %19 = arith.truncf %18 : vector<8x128xf32> to vector<8x128xbf16>
    %c0_12 = arith.constant 0 : index
    %c0_13 = arith.constant 0 : index
    %20 = vector.load %arg13[%c0_12, %c0_13] : memref<8x512xf32, #tpu.memory_space<vmem>>, vector<8x512xf32>
    %c0_14 = arith.constant 0 : index
    %c0_15 = arith.constant 0 : index
    %c0_16 = arith.constant 0 : index
    %21 = vector.load %arg7[%c0_14, %c0_15, %c0_16] : memref<1x128x512xbf16, #tpu.memory_space<vmem>>, vector<1x128x512xbf16>
    %22 = vector.shape_cast %21 : vector<1x128x512xbf16> to vector<128x512xbf16>
    %cst_17 = arith.constant dense<0.000000e+00> : vector<8x512xf32>
    %23 = tpu.matmul %19, %22, %cst_17 {dimension_numbers = #tpu.dot_dimension_numbers<[1], [0], [0], [1], [0, 0, 1, 1], [], []>} : vector<8x128xbf16>, vector<128x512xbf16>, vector<8x512xf32> -> vector<8x512xf32>
    %24 = arith.addf %20, %23 : vector<8x512xf32>
    %c0_18 = arith.constant 0 : index
    %c0_19 = arith.constant 0 : index
    %25 = vector.load %arg13[%c0_18, %c0_19] : memref<8x512xf32, #tpu.memory_space<vmem>>, vector<8x512xf32>
    tpu.vector_store %arg13[%c0_18, %c0_19], %24 {strides = array<i32>} : memref<8x512xf32, #tpu.memory_space<vmem>>, vector<8x512xf32>,
    %c3_i32 = arith.constant 3 : i32
    %26 = arith.cmpi eq, %arg1, %c3_i32 : i32
    %27 = arith.extui %26 : i1 to i32
    %c0_i32_20 = arith.constant 0 : i32
    %28 = arith.cmpi ne, %27, %c0_i32_20 : i32
    scf.if %28 {
      %c0_21 = arith.constant 0 : index
      %c0_22 = arith.constant 0 : index
      %29 = vector.load %arg13[%c0_21, %c0_22] : memref<8x512xf32, #tpu.memory_space<vmem>>, vector<8x512xf32>
      %c0_23 = arith.constant 0 : index
      %c0_24 = arith.constant 0 : index
      %c0_25 = arith.constant 0 : index
      %30 = vector.load %arg8[%c0_23, %c0_24, %c0_25] : memref<1x1x512xf32, #tpu.memory_space<vmem>>, vector<1x1x512xf32>
      %31 = vector.shape_cast %30 : vector<1x1x512xf32> to vector<1x512xf32>
      %32 = vector.broadcast %31 : vector<1x512xf32> to vector<8x512xf32>
      %33 = arith.addf %29, %32 : vector<8x512xf32>
      %cst_26 = arith.constant 0.000000e+00 : f32
      %34 = vector.broadcast %cst_26 : f32 to vector<8x512xf32>
      %35 = arith.maximumf %33, %34 : vector<8x512xf32>
      %36 = arith.truncf %35 : vector<8x512xf32> to vector<8x512xbf16>
      %c0_27 = arith.constant 0 : index
      %c0_28 = arith.constant 0 : index
      %c0_29 = arith.constant 0 : index
      %37 = vector.load %arg9[%c0_27, %c0_28, %c0_29] : memref<1x4x512xbf16, #tpu.memory_space<vmem>>, vector<1x4x512xbf16>
      %38 = vector.shape_cast %37 : vector<1x4x512xbf16> to vector<4x512xbf16>
      %cst_30 = arith.constant dense<0.000000e+00> : vector<8x4xf32>
      %39 = tpu.matmul %36, %38, %cst_30 {dimension_numbers = #tpu.dot_dimension_numbers<[1], [1], [0], [0], [0, 0, 1, 0], [], []>} : vector<8x512xbf16>, vector<4x512xbf16>, vector<8x4xf32> -> vector<8x4xf32>
      %c0_31 = arith.constant 0 : index
      %c0_32 = arith.constant 0 : index
      %c0_33 = arith.constant 0 : index
      %40 = vector.load %arg10[%c0_31, %c0_32, %c0_33] : memref<1x1x4xf32, #tpu.memory_space<vmem>>, vector<1x1x4xf32>
      %41 = vector.shape_cast %40 : vector<1x1x4xf32> to vector<1x4xf32>
      %42 = vector.broadcast %41 : vector<1x4xf32> to vector<8x4xf32>
      %43 = arith.addf %39, %42 : vector<8x4xf32>
      %c0_34 = arith.constant 0 : index
      %c0_35 = arith.constant 0 : index
      %44 = vector.load %arg11[%c0_34, %c0_35] : memref<8x4xf32, #tpu.memory_space<vmem>>, vector<8x4xf32>
      tpu.vector_store %arg11[%c0_34, %c0_35], %43 {strides = array<i32>} : memref<8x4xf32, #tpu.memory_space<vmem>>, vector<8x4xf32>,
    } else {
    }
    return
  }
  func.func @transform_0(%arg0: i32, %arg1: i32) -> (i32, i32) {
    %c0_i32 = arith.constant 0 : i32
    %c0_i32_0 = arith.constant 0 : i32
    %c0_i32_1 = arith.constant 0 : i32
    return %c0_i32, %c0_i32_0 : i32, i32
  }
  func.func @transform_1(%arg0: i32, %arg1: i32) -> (i32, i32, i32) {
    %c0_i32 = arith.constant 0 : i32
    %c0_i32_0 = arith.constant 0 : i32
    %c0_i32_1 = arith.constant 0 : i32
    return %arg0, %c0_i32, %c0_i32_0 : i32, i32, i32
  }
  func.func @transform_2(%arg0: i32, %arg1: i32) -> (i32, i32, i32) {
    %c0_i32 = arith.constant 0 : i32
    %c0_i32_0 = arith.constant 0 : i32
    %c0_i32_1 = arith.constant 0 : i32
    return %arg0, %c0_i32, %c0_i32_0 : i32, i32, i32
  }
  func.func @transform_3(%arg0: i32, %arg1: i32) -> (i32, i32, i32) {
    %c0_i32 = arith.constant 0 : i32
    %c0_i32_0 = arith.constant 0 : i32
    return %arg0, %c0_i32, %arg1 : i32, i32, i32
  }
  func.func @transform_4(%arg0: i32, %arg1: i32) -> (i32, i32, i32) {
    %c0_i32 = arith.constant 0 : i32
    %c0_i32_0 = arith.constant 0 : i32
    return %arg0, %c0_i32, %arg1 : i32, i32, i32
  }
  func.func @transform_5(%arg0: i32, %arg1: i32) -> (i32, i32, i32) {
    %c0_i32 = arith.constant 0 : i32
    %c0_i32_0 = arith.constant 0 : i32
    return %arg0, %arg1, %c0_i32 : i32, i32, i32
  }
  func.func @transform_6(%arg0: i32, %arg1: i32) -> (i32, i32, i32) {
    %c0_i32 = arith.constant 0 : i32
    %c0_i32_0 = arith.constant 0 : i32
    %c0_i32_1 = arith.constant 0 : i32
    return %arg0, %c0_i32, %c0_i32_0 : i32, i32, i32
  }
  func.func @transform_7(%arg0: i32, %arg1: i32) -> (i32, i32, i32) {
    %c0_i32 = arith.constant 0 : i32
    %c0_i32_0 = arith.constant 0 : i32
    %c0_i32_1 = arith.constant 0 : i32
    return %arg0, %c0_i32, %c0_i32_0 : i32, i32, i32
  }
  func.func @transform_8(%arg0: i32, %arg1: i32) -> (i32, i32, i32) {
    %c0_i32 = arith.constant 0 : i32
    %c0_i32_0 = arith.constant 0 : i32
    %c0_i32_1 = arith.constant 0 : i32
    return %arg0, %c0_i32, %c0_i32_0 : i32, i32, i32
  }
  func.func @transform_9(%arg0: i32, %arg1: i32) -> (i32, i32) {
    %c0_i32 = arith.constant 0 : i32
    %c0_i32_0 = arith.constant 0 : i32
    %c0_i32_1 = arith.constant 0 : i32
    return %c0_i32, %c0_i32_0 : i32, i32
  }
}

</mosaic_0001>

<bundles_post_ra>
// kernel: neuron_model_forward.1
= control target key start
LH: loop header
LB: loop body
LE: loop exit
PB: predicated region body
PF: predicated region fallthrough
CT: control target
= control target key end

     0   :  { %s3075_s0 = inlined_call_operand.vmem [shape: f32[8,4], index: 0, kind: input, shape index: {}]   ;;  %s3076_s1 = inlined_call_operand.hbm [shape: bf16[8,4,512], index: 1, kind: input, shape index: {}]   ;;  %s3077_s2 = inlined_call_operand.hbm [shape: f32[8,1,512], index: 2, kind: input, shape index: {}]   ;;  %s3078_s3 = inlined_call_operand.hbm [shape: bf16[8,512,512], index: 3, kind: input, shape index: {}]   ;;  %s3079_s4 = inlined_call_operand.hbm [shape: f32[8,1,512], index: 4, kind: input, shape index: {}]   ;;  %s3080_s5 = inlined_call_operand.hbm [shape: bf16[8,512,512], index: 5, kind: input, shape index: {}]   ;;  %s3081_s6 = inlined_call_operand.hbm [shape: f32[8,1,512], index: 6, kind: input, shape index: {}]   ;;  %s3082_s7 = inlined_call_operand.hbm [shape: bf16[8,4,512], index: 7, kind: input, shape index: {}]   ;;  %s3083_s8 = inlined_call_operand.vmem [shape: f32[8,1,4], index: 8, kind: input, shape index: {}]   ;;  %s3084_s9 = inlined_call_operand.vmem [shape: f32[8,4], index: 9, kind: output, shape index: {}]  }
   0x1   :  { %3116 = sst [smem:[#allocation32_spill]] %s3075_s0 }
   0x2   :  { %3117 = sst [smem:[#allocation33_spill]] %s3076_s1 }
   0x3   :  { %3118 = sst [smem:[#allocation34_spill]] %s3077_s2 }
   0x4   :  { %3119 = sst [smem:[#allocation35_spill]] %s3078_s3 }
   0x5   :  { %3120 = sst [smem:[#allocation36_spill]] %s3079_s4 }
   0x6   :  { %3121 = sst [smem:[#allocation37_spill]] %s3081_s6 }
   0x7   :  { %3122 = sst [smem:[#allocation38_spill]] %s3083_s8 }
   0x8   :  { %3123 = sst [smem:[#allocation39_spill]] %s3084_s9 }
   0x9   :  { %14 = vsyncpa [#allocation5], 0 }
   0xa   :  { %16 = vsyncpa [#allocation5 + $0x1], 0 }
   0xb   :  { %17 = vsyncpa [#allocation7], 0 }
   0xc   :  { %19 = vsyncpa [#allocation7 + $0x1], 0 }
   0xd   :  { %20 = vsyncpa [#allocation10], 0 }
   0xe   :  { %22 = vsyncpa [#allocation10 + $0x1], 0 }
   0xf   :  { %23 = vsyncpa [#allocation13], 0 }
  0x10   :  { %25 = vsyncpa [#allocation13 + $0x1], 0  ;;  %s2504_s30 = smov 0   ;;  %s2506_s10 = smov 0  }
  0x11   :  { %s2508_s11 = smov 0   ;;  %s2510_s12 = smov 0  }
  0x12   :  { %s2512_s13 = smov 0   ;;  %s2514_s14 = smov 0  }
  0x13   :  { %s2516_s15 = smov 0   ;;  %s2518_s16 = smov 0  }
  0x14   :  { %s2520_s17 = smov 0   ;;  %s2522_s18 = smov 0  }
  0x15   :  { %s2524_s19 = smov 0  }
  0x16 LB: > { %3124 = sst [smem:[#allocation20_spill]] %s2400_s10  ;;  %p78_p0 = scmp.ne.s32.totalorder %s2416_s14, %s2412_s13  ;;  %s2436_s19 = sphi %s2524_s19, %s31_s19   ;;  %s2432_s18 = sphi %s2522_s18, %s3197_s18   ;;  %s2428_s17 = sphi %s2520_s17, %s3196_s17   ;;  %s2424_s16 = sphi %s2518_s16, %s3195_s16   ;;  %s2420_s15 = sphi %s2516_s15, %s3194_s15   ;;  %s2416_s14 = sphi %s2514_s14, %s3191_s14   ;;  %s2412_s13 = sphi %s2512_s13, %s3190_s13   ;;  %s2408_s12 = sphi %s2510_s12, %s3189_s12   ;;  %s2404_s11 = sphi %s2508_s11, %s3188_s11   ;;  %s2400_s10 = sphi %s2506_s10, %s3187_s10   ;;  %s2396_s30 = sphi %s2504_s30, %s3186_s30  }
  0x17   : > { %3125 = sst [smem:[#allocation21_spill]] %s2404_s11  ;;  %p3088_p1 = scmp.eq.s32.totalorder %s2436_s19, 0 }
  0x18   : > { %3126 = sst [smem:[#allocation22_spill]] %s2412_s13  ;;  %p3087_p3 = scmp.lt.s32.totalorder %s2436_s19, 32 }
  0x19   : > { %3127 = sst [smem:[#allocation23_spill]] %s2416_s14  ;;  %p80_p4 = por %p3088_p1, %p78_p0 }
  0x1a   : > { %3128 = sst [smem:[#allocation24_spill]] %s2420_s15  ;;  %s2569_s21 = sand.u32 1, %s2416_s14  }
  0x1b   : > { %3129 = sst [smem:[#allocation25_spill]] %s2424_s16  ;;  %s2572_s22 = sand.u32 1, %s2436_s19  }
  0x1c   : > { %s3085_s23 = sshll.u32 %s2569_s21, 2  ;;  %p2577_p5 = pnand %p3087_p3, %p80_p4 }
  0x1d   : > { %s3086_s25 = sshll.u32 %s2432_s18, 6  ;;  %s3131_s2 = sld [smem:[#allocation34_spill]] }
  0x1e   : > { %s3130_s24 = scalar_select %p2577_p5, 1, 0 }
  0x1f   : > { %s343_s29 = scalar_lea.vmem [#allocation6], %s3085_s23  ;;  %p2600_p9 = pneg %p2577_p5 }
  0x20   : > { %s351_s20 = sshll.u32 %s343_s29, 4  ;;  %s2592_s20 = int_to_ptr.vmem [resolvable:$true] %s351_s20 }
  0x21   : > { %s3132_s8 = scalar_select %p2600_p9, 1, 0 }
  0x23   : > { %s2587_s28 = scalar_lea.hbm %s3131_s2, %s3086_s25  ;;  %s2125_s29 = scalar_lea.hbm %s3131_s2, 512 }
  0x24   : > { %s2120_s0 = scalar_lea.hbm %s2587_s28, 64  ;;  %p2126_p12 = scmp.lt.u32.totalorder %s2587_s28, %s3131_s2 }
  0x25   : > { %p2121_p8 = scmp.ne.s32.totalorder %s2587_s28, %s2120_s0  ;;  %p2127_p13 = scmp.lt.u32.totalorder %s2125_s29, %s2120_s0 }
  0x26   : > { %p2129_p4 = scmp.lt.u32.totalorder %s2120_s0, %s2587_s28 }
  0x27   : > { %p2123_p10 = pnand %p2600_p9, %p2121_p8  ;;  %p2128_p0 = por %p2127_p13, %p2126_p12 }
  0x29   : > { %p2124_p11 = pneg %p2123_p10  ;;  %p2130_p3 = por %p2129_p4, %p2128_p0 }
  0x2b   : > { %p2131_p1 = pnand %p2130_p3, %p2124_p11 }
  0x2d   : > { %2134 = shalt.err (!%p2131_p1)
}
  0x2e   : > { %s2135_s9 = scalar_lea.vmem %s2592_s20, 64  ;;  %s2438_s26 = smov [#allocation6]  }
  0x2f   : > { %p2136_p8 = scmp.ne.s32.totalorder %s2592_s20, %s2135_s9  ;;  %s2140_s27 = sshll.u32 %s2438_s26, 4  ;;  %s2141_s27 = int_to_ptr.vmem [resolvable:$false] %s2140_s27 }
  0x30   : > { %s2142_s23 = scalar_lea.vmem %s2141_s27, 128  ;;  %p2143_p6 = scmp.lt.s32.totalorder %s2592_s20, %s2141_s27 }
  0x31   : > { %p2138_p10 = pnand %p2136_p8, %p2600_p9  ;;  %p2144_p7 = scmp.lt.s32.totalorder %s2142_s23, %s2135_s9 }
  0x33   : > { %p2139_p2 = pneg %p2138_p10  ;;  %p2145_p12 = por %p2144_p7, %p2143_p6 }
  0x35   : > { %p2146_p13 = pnand %p2145_p12, %p2139_p2 }
  0x37   : > { %2149 = shalt.err (!%p2146_p13)
}
  0x38   : > { %s3133_s0 = scalar_lea.sflag [#allocation7], %s2572_s22  ;;  %p3134_p1 = scmp.lt.s32.totalorder %s2436_s19, 33 }
  0x39   : > { %1924 = dma.hbm_to_vmem [thread:$0]  (!%p2577_p5), %s2587_s28, 64, %s2592_s20, %s3133_s0  }
  0x3a   : > { %p3135_p2 = scmp.ge.s32.totalorder %s2436_s19, 1  ;;  %s3089_s25 = sadd.s32 4294967295, %s2436_s19  }
  0x3b   : > { %s40_s29 = sadd.s32 1, %s2428_s17  ;;  %s43_s26 = sadd.s32 1, %s2432_s18 }
  0x3c   : > { %p2629_p3 = pnand %p3135_p2, %p3134_p1  ;;  %p41_p6 = scmp.ge.s32.totalorder %s40_s29, 4 }
  0x3d   : > { %p85_p7 = scmp.eq.s32.totalorder %s3089_s25, 0  ;;  %s125_s27 = sadd.s32 1, %s2404_s11 }
  0x3e   : > { %s3136_s9 = scalar_select %p2629_p3, 1, 0 }
  0x3f   : > { %p132_p11 = scmp.ne.s32.totalorder %s2404_s11, %s2400_s10  ;;  %s3199_s29 = smov (%p41_p6, %s40_s29), 0 }
  0x40   : > { %3137 = sst [smem:[#allocation26_spill]] %s3199_s29  ;;  %s3201_s26 = smov (!%p41_p6, %s43_s26), %s2432_s18 }
  0x41   : > { %p3138_p0 = scmp.ne.s32.totalorder %s2412_s13, %s2408_s12  ;;  %s121_s28 = ssub.s32 %s2428_s17, %s3199_s29 }
  0x42   : > { %p45_p8 = scmp.ge.s32.totalorder %s3201_s26, 8  ;;  %p3141_p10 = scmp.eq.s32.totalorder %s2436_s19, 0 }
  0x43   : > { %p2647_p4 = por %p85_p7, %p3138_p0  ;;  %p138_p13 = scmp.ne.s32.totalorder %s2400_s10, %s2396_s30 }
  0x44   : > { %p2655_p12 = por %p132_p11, %p3141_p10  ;;  %s360_s12 = sand.u32 1, %s2404_s11  }
  0x45   : > { %s3139_s20 = scalar_select %p2647_p4, 1, 0 }
  0x46   : > { %s3203_s26 = smov (%p45_p8, %s3201_s26), 0  ;;  %p2664_p1 = por %p138_p13, %p85_p7 }
  0x47   : > { %3140 = sst [smem:[#allocation27_spill]] %s3139_s20  ;;  %s2668_s25 = sshll.u32 %s360_s12, 8 }
  0x48   : > { %3143 = sst [smem:[#allocation28_spill]] %s3203_s26  ;;  %s68_s2 = ssub.s32 %s2432_s18, %s3203_s26 }
  0x49   : > { %s3144_s0 = scalar_select %p2664_p1, 1, 0 }
  0x4a   : > { %p69_p2 = scmp.eq.s32.totalorder %s68_s2, 0  ;;  %s122_s29 = sor.u32 %s121_s28, %s68_s2 }
  0x4b   : > { %3145 = sst [smem:[#allocation29_spill]] %s3144_s0  ;;  %p123_p6 = scmp.eq.s32.totalorder %s122_s29, 0 }
  0x4c   : > { %s362_s15 = scalar_lea.vmem [#allocation8], %s2668_s25  ;;  %s3146_s30 = sadd.s32 1, %s2416_s14 }
  0x4d   : > { %s370_s16 = sshll.u32 %s362_s15, 4  ;;  %p3149_p7 = scmp.lt.s32.totalorder %s2436_s19, 32  ;;  %s2681_s16 = int_to_ptr.vmem [resolvable:$true] %s370_s16 }
  0x4e   : > { %s2676_s10 = scalar_select %p69_p2, %s2416_s14, %s3146_s30  }
  0x4f   : > { %s2679_s20 = scalar_select %p123_p6, %s2404_s11, %s125_s27  }
  0x50   : > { %3147 = sst [smem:[#allocation30_spill]] %s2676_s10  ;;  %p2687_p11 = pnand %p3149_p7, %p2655_p12 }
  0x51   : > { %3148 = sst [smem:[#allocation31_spill]] %s2679_s20  ;;  %s1759_s26 = sshll.u32 %s2432_s18, 2 }
  0x52   : > { %s3150_s0 = scalar_select %p2687_p11, 1, 0 }
  0x53   : > { %s388_s13 = sadd.s32 %s2428_s17, %s1759_s26  ;;  %s383_s2 = scalar_lea.vmem [#allocation9], %s360_s12 }
  0x54   : > { %s392_s29 = sshll.u32 %s383_s2, 4  ;;  %s1760_s28 = sshll.u32 %s388_s13, 4  ;;  %s2693_s29 = int_to_ptr.vmem [resolvable:$true] %s392_s29 }
  0x55   : > { %s3151_s4 = sld [smem:[#allocation36_spill]]  ;;  %s3111_s23 = scalar_lea.sflag [#allocation10], %s2572_s22 }
  0x56   : > { %p2705_p8 = pneg %p2687_p11 }
  0x58   : > { %s3152_s26 = scalar_select %p2705_p8, 1, 0 }
  0x5b   : > { %s2698_s27 = scalar_lea.hbm %s3151_s4, %s1760_s28  ;;  %s2155_s2 = scalar_lea.hbm %s3151_s4, 512 }
  0x5c   : > { %s2150_s10 = scalar_lea.hbm %s2698_s27, 16  ;;  %p2156_p13 = scmp.lt.u32.totalorder %s2698_s27, %s3151_s4 }
  0x5d   : > { %p2151_p0 = scmp.ne.s32.totalorder %s2698_s27, %s2150_s10  ;;  %p2157_p2 = scmp.lt.u32.totalorder %s2155_s2, %s2150_s10 }
  0x5e   : > { %p2159_p7 = scmp.lt.u32.totalorder %s2150_s10, %s2698_s27 }
  0x5f   : > { %p2153_p10 = pnand %p2705_p8, %p2151_p0  ;;  %p2158_p6 = por %p2157_p2, %p2156_p13 }
  0x61   : > { %p2154_p12 = pneg %p2153_p10  ;;  %p2160_p1 = por %p2159_p7, %p2158_p6 }
  0x63   : > { %p2161_p4 = pnand %p2160_p1, %p2154_p12 }
  0x65   : > { %2164 = shalt.err (!%p2161_p4)
}
  0x66   : > { %s2165_s30 = scalar_lea.vmem %s2693_s29, 16  ;;  %s2439_s13 = smov [#allocation9]  }
  0x67   : > { %p2166_p0 = scmp.ne.s32.totalorder %s2693_s29, %s2165_s30  ;;  %s2170_s12 = sshll.u32 %s2439_s13, 4  ;;  %s2171_s12 = int_to_ptr.vmem [resolvable:$false] %s2170_s12 }
  0x68   : > { %s2172_s28 = scalar_lea.vmem %s2171_s12, 32  ;;  %p2173_p5 = scmp.lt.s32.totalorder %s2693_s29, %s2171_s12 }
  0x69   : > { %p2168_p10 = pnand %p2166_p0, %p2705_p8  ;;  %p2174_p9 = scmp.lt.s32.totalorder %s2172_s28, %s2165_s30 }
  0x6b   : > { %p2169_p3 = pneg %p2168_p10  ;;  %p2175_p13 = por %p2174_p9, %p2173_p5 }
  0x6d   : > { %p2176_p2 = pnand %p2175_p13, %p2169_p3 }
  0x6f   : > { %2179 = shalt.err (!%p2176_p2)
}
  0x70   : > { %1930 = dma.hbm_to_vmem [thread:$0]  (!%p2687_p11), %s2698_s27, 16, %s2693_s29, %s3111_s23  }
  0x71   : > { %s403_s10 = scalar_lea.vmem [#allocation11], %s2668_s25  ;;  %s3153_s15 = sshll.u32 %s2432_s18, 6 }
  0x72   : > { %s413_s2 = sshll.u32 %s403_s10, 4  ;;  %s3154_s6 = sld [smem:[#allocation37_spill]]  ;;  %s2731_s2 = int_to_ptr.vmem [resolvable:$true] %s413_s2 }
  0x73   : > { %s3155_s28 = sshll.u32 %s2569_s21, 2  ;;  %s3110_s20 = scalar_lea.sflag [#allocation13], %s2572_s22 }
  0x74   : > { %s427_s4 = scalar_lea.vmem [#allocation12], %s3155_s28  ;;  %p3156_p9 = scmp.ne.s32.totalorder %s3132_s8, 0 }
  0x75   : > { %s435_s14 = sshll.u32 %s427_s4, 4  ;;  %s436_s14 = int_to_ptr.vmem [resolvable:$true] %s435_s14 }
  0x78   : > { %s2738_s12 = scalar_lea.hbm %s3154_s6, %s3153_s15  ;;  %s2185_s10 = scalar_lea.hbm %s3154_s6, 512 }
  0x79   : > { %s2180_s29 = scalar_lea.hbm %s2738_s12, 64  ;;  %p2186_p1 = scmp.lt.u32.totalorder %s2738_s12, %s3154_s6 }
  0x7a   : > { %p2181_p5 = scmp.ne.s32.totalorder %s2738_s12, %s2180_s29  ;;  %p2187_p12 = scmp.lt.u32.totalorder %s2185_s10, %s2180_s29 }
  0x7b   : > { %p2189_p7 = scmp.lt.u32.totalorder %s2180_s29, %s2738_s12 }
  0x7c   : > { %p2183_p3 = pnand %p2181_p5, %p3156_p9  ;;  %p2188_p6 = por %p2187_p12, %p2186_p1 }
  0x7e   : > { %p2184_p4 = pneg %p2183_p3  ;;  %p2190_p0 = por %p2189_p7, %p2188_p6 }
  0x80   : > { %p2191_p10 = pnand %p2190_p0, %p2184_p4 }
  0x82   : > { %2194 = shalt.err (!%p2191_p10)
}
  0x83   : > { %s2195_s4 = scalar_lea.vmem %s436_s14, 64  ;;  %s2440_s13 = smov [#allocation12]  }
  0x84   : > { %p2196_p13 = scmp.ne.s32.totalorder %s436_s14, %s2195_s4  ;;  %s2200_s28 = sshll.u32 %s2440_s13, 4  ;;  %s2201_s28 = int_to_ptr.vmem [resolvable:$false] %s2200_s28 }
  0x85   : > { %s2202_s25 = scalar_lea.vmem %s2201_s28, 128  ;;  %p2203_p3 = scmp.lt.s32.totalorder %s436_s14, %s2201_s28 }
  0x86   : > { %p2198_p2 = pnand %p2196_p13, %p3156_p9  ;;  %p2204_p11 = scmp.lt.s32.totalorder %s2202_s25, %s2195_s4 }
  0x88   : > { %p2199_p5 = pneg %p2198_p2  ;;  %p2205_p8 = por %p2204_p11, %p2203_p3 }
  0x8a   : > { %p2206_p1 = pnand %p2205_p8, %p2199_p5 }
  0x8c   : > { %2209 = shalt.err (!%p2206_p1)
}
  0x8d   : > { %p3157_p12 = scmp.ne.s32.totalorder %s3130_s24, 0  ;;  %s3112_s29 = sshll.u32 %s2569_s21, 3 }
  0x8e   : > { %s1853_s27 = sshll.u32 %s2432_s18, 7  ;;  %s3158_s1 = sld [smem:[#allocation33_spill]] }
  0x8f   : > { %1936 = dma.hbm_to_vmem [thread:$0]  (!%p3157_p12), %s2738_s12, 64, %s436_s14, %s3110_s20  }
  0x90   : > { %s324_s4 = scalar_lea.vmem [#allocation4], %s3112_s29  ;;  %s2776_s14 = scalar_lea.hbm %s3082_s7, %s1853_s27 }
  0x91   : > { %s332_s13 = sshll.u32 %s324_s4, 4  ;;  %s321_s12 = scalar_lea.sflag [#allocation5], %s2569_s21  ;;  %s2771_s13 = int_to_ptr.vmem [resolvable:$true] %s332_s13 }
  0x94   : > { %s2767_s30 = scalar_lea.hbm %s3158_s1, %s1853_s27  ;;  %s2215_s23 = scalar_lea.hbm %s3158_s1, 1024 }
  0x95   : > { %s2210_s20 = scalar_lea.hbm %s2767_s30, 128  ;;  %p2216_p6 = scmp.lt.u32.totalorder %s2767_s30, %s3158_s1 }
  0x96   : > { %p2211_p11 = scmp.ne.s32.totalorder %s2767_s30, %s2210_s20  ;;  %p2217_p7 = scmp.lt.u32.totalorder %s2215_s23, %s2210_s20 }
  0x97   : > { %p2219_p10 = scmp.lt.u32.totalorder %s2210_s20, %s2767_s30 }
  0x98   : > { %p2213_p8 = pnand %p2211_p11, %p3156_p9  ;;  %p2218_p0 = por %p2217_p7, %p2216_p6 }
  0x9a   : > { %p2214_p4 = pneg %p2213_p8  ;;  %p2220_p13 = por %p2219_p10, %p2218_p0 }
  0x9c   : > { %p2221_p2 = pnand %p2220_p13, %p2214_p4 }
  0x9e   : > { %2224 = shalt.err (!%p2221_p2)
}
  0x9f   : > { %s2225_s27 = scalar_lea.vmem %s2771_s13, 128  ;;  %s2441_s4 = smov [#allocation4]  }
  0xa0   : > { %p2226_p5 = scmp.ne.s32.totalorder %s2771_s13, %s2225_s27  ;;  %s2230_s28 = sshll.u32 %s2441_s4, 4  ;;  %s2231_s28 = int_to_ptr.vmem [resolvable:$false] %s2230_s28 }
  0xa1   : > { %s2232_s6 = scalar_lea.vmem %s2231_s28, 256  ;;  %p2233_p11 = scmp.lt.s32.totalorder %s2771_s13, %s2231_s28 }
  0xa2   : > { %p2228_p3 = pnand %p2226_p5, %p3156_p9  ;;  %p2234_p8 = scmp.lt.s32.totalorder %s2232_s6, %s2225_s27 }
  0xa4   : > { %p2229_p1 = pneg %p2228_p3  ;;  %p2235_p6 = por %p2234_p8, %p2233_p11 }
  0xa6   : > { %p2236_p7 = pnand %p2235_p6, %p2229_p1 }
  0xa8   : > { %2239 = shalt.err (!%p2236_p7)
}
  0xa9   : > { %1921 = dma.hbm_to_vmem [thread:$0]  (!%p3157_p12), %s2767_s30, 128, %s2771_s13, %s321_s12  }
  0xaa   : > { %s1757_s20 = sshll.u32 %s2432_s18, 8  ;;  %s3159_s3 = sld [smem:[#allocation35_spill]] }
  0xab   : > { %s367_s23 = sadd.s32 %s2428_s17, %s1757_s20  ;;  %s1855_s27 = sshll.u32 %s2428_s17, 6 }
  0xac   : > { %s1758_s29 = sshll.u32 %s367_s23, 6  ;;  %p3160_p0 = scmp.ne.s32.totalorder %s3152_s26, 0 }
  0xb0   : > { %s2807_s15 = scalar_lea.hbm %s3159_s3, %s1758_s29  ;;  %s2245_s12 = scalar_lea.hbm %s3159_s3, 131072 }
  0xb1   : > { %s2240_s4 = scalar_lea.hbm %s2807_s15, 4096  ;;  %p2246_p2 = scmp.lt.u32.totalorder %s2807_s15, %s3159_s3 }
  0xb2   : > { %p2241_p4 = scmp.ne.s32.totalorder %s2807_s15, %s2240_s4  ;;  %p2247_p5 = scmp.lt.u32.totalorder %s2245_s12, %s2240_s4 }
  0xb3   : > { %p2249_p1 = scmp.lt.u32.totalorder %s2240_s4, %s2807_s15 }
  0xb4   : > { %p2243_p10 = pnand %p2241_p4, %p3160_p0  ;;  %p2248_p3 = por %p2247_p5, %p2246_p2 }
  0xb6   : > { %p2244_p13 = pneg %p2243_p10  ;;  %p2250_p11 = por %p2249_p1, %p2248_p3 }
  0xb8   : > { %p2251_p8 = pnand %p2250_p11, %p2244_p13 }
  0xba   : > { %2254 = shalt.err (!%p2251_p8)
}
  0xbb   : > { %s2255_s23 = scalar_lea.vmem %s2681_s16, 4096  ;;  %s2442_s29 = smov [#allocation8]  }
  0xbc   : > { %p2256_p6 = scmp.ne.s32.totalorder %s2681_s16, %s2255_s23  ;;  %s2260_s25 = sshll.u32 %s2442_s29, 4  ;;  %s2261_s25 = int_to_ptr.vmem [resolvable:$false] %s2260_s25 }
  0xbd   : > { %s2262_s10 = scalar_lea.vmem %s2261_s25, 8192  ;;  %p2263_p10 = scmp.lt.s32.totalorder %s2681_s16, %s2261_s25 }
  0xbe   : > { %p2258_p7 = pnand %p2256_p6, %p3160_p0  ;;  %p2264_p12 = scmp.lt.s32.totalorder %s2262_s10, %s2255_s23 }
  0xc0   : > { %p2259_p4 = pneg %p2258_p7  ;;  %p2265_p2 = por %p2264_p12, %p2263_p10 }
  0xc2   : > { %p2266_p5 = pnand %p2265_p2, %p2259_p4 }
  0xc4   : > { %2269 = shalt.err (!%p2266_p5)
}
  0xc5   : > { %s2443_s4 = smov 256   ;;  %s2444_s30 = smov 64  }
  0xc6   : > { %s2445_s13 = smov 4   ;;  %p3161_p13 = scmp.ne.s32.totalorder %s3150_s0, 0 }
  0xc7   : > { %s3162_s12 = scalar_lea.sflag [#allocation7], %s2572_s22  ;;  %s410_s28 = sadd.s32 %s1855_s27, %s1757_s20 }
  0xc8   : > { %1927 = dma.hbm_to_vmem [thread:$0]  (!%p3161_p13), %s2807_s15, 4096, %s2681_s16, %s3162_s12, %s2443_s4, %s2444_s30, %s2445_s13  }
  0xc9   : > { %s1765_s6 = sshll.u32 %s410_s28, 6  ;;  %s3163_s23 = sshll.u32 %s2569_s21, 3 }
  0xca   : > { %s446_s29 = scalar_lea.vmem [#allocation14], %s3163_s23  ;;  %s2843_s3 = scalar_lea.hbm %s3080_s5, %s1765_s6 }
  0xcb   : > { %s454_s25 = sshll.u32 %s446_s29, 4  ;;  %s2270_s11 = scalar_lea.hbm %s2843_s3, 4096  ;;  %s2845_s25 = int_to_ptr.vmem [resolvable:$true] %s454_s25 }
  0xcc   : > { %p2271_p12 = scmp.ne.s32.totalorder %s2843_s3, %s2270_s11  ;;  %s2275_s20 = scalar_lea.hbm %s3080_s5, 131072 }
  0xcd   : > { %p2276_p11 = scmp.lt.u32.totalorder %s2843_s3, %s3080_s5  ;;  %p2277_p8 = scmp.lt.u32.totalorder %s2275_s20, %s2270_s11 }
  0xce   : > { %p2273_p3 = pnand %p2271_p12, %p3160_p0  ;;  %p2279_p7 = scmp.lt.u32.totalorder %s2270_s11, %s2843_s3 }
  0xcf   : > { %p2278_p6 = por %p2277_p8, %p2276_p11 }
  0xd0   : > { %p2274_p1 = pneg %p2273_p3 }
  0xd1   : > { %p2280_p4 = por %p2279_p7, %p2278_p6 }
  0xd3   : > { %p2281_p10 = pnand %p2280_p4, %p2274_p1 }
  0xd5   : > { %2284 = shalt.err (!%p2281_p10)
}
  0xd6   : > { %s2285_s1 = scalar_lea.vmem %s2731_s2, 4096  ;;  %s2446_s30 = smov [#allocation11]  }
  0xd7   : > { %p2286_p2 = scmp.ne.s32.totalorder %s2731_s2, %s2285_s1  ;;  %s2290_s13 = sshll.u32 %s2446_s30, 4  ;;  %s2291_s13 = int_to_ptr.vmem [resolvable:$false] %s2290_s13 }
  0xd8   : > { %s2292_s12 = scalar_lea.vmem %s2291_s13, 8192  ;;  %p2293_p3 = scmp.lt.s32.totalorder %s2731_s2, %s2291_s13 }
  0xd9   : > { %p2288_p5 = pnand %p2286_p2, %p3160_p0  ;;  %p2294_p9 = scmp.lt.s32.totalorder %s2292_s12, %s2285_s1 }
  0xdb   : > { %p2289_p12 = pneg %p2288_p5  ;;  %p2295_p11 = por %p2294_p9, %p2293_p3 }
  0xdd   : > { %p2296_p8 = pnand %p2295_p11, %p2289_p12 }
  0xdf   : > { %2299 = shalt.err (!%p2296_p8)
}
  0xe0   : > { %s2447_s11 = smov 16   ;;  %s3164_s28 = scalar_lea.sflag [#allocation10], %s2572_s22 }
  0xe1   : > { %1933 = dma.hbm_to_vmem [thread:$0]  (!%p3161_p13), %s2843_s3, 4096, %s2731_s2, %s3164_s28, %s2443_s4, %s2443_s4, %s2447_s11  }
  0xe2   : > { %s2300_s26 = scalar_lea.hbm %s2776_s14, 128  ;;  %p3165_p9 = scmp.ne.s32.totalorder %s3132_s8, 0 }
  0xe3   : > { %p2301_p0 = scmp.ne.s32.totalorder %s2776_s14, %s2300_s26  ;;  %s2305_s0 = scalar_lea.hbm %s3082_s7, 1024 }
  0xe4   : > { %p2306_p7 = scmp.lt.u32.totalorder %s2776_s14, %s3082_s7  ;;  %p2307_p4 = scmp.lt.u32.totalorder %s2305_s0, %s2300_s26 }
  0xe5   : > { %p2303_p1 = pnand %p2301_p0, %p3165_p9  ;;  %p2309_p2 = scmp.lt.u32.totalorder %s2300_s26, %s2776_s14 }
  0xe6   : > { %p2308_p10 = por %p2307_p4, %p2306_p7 }
  0xe7   : > { %p2304_p6 = pneg %p2303_p1 }
  0xe8   : > { %p2310_p5 = por %p2309_p2, %p2308_p10 }
  0xea   : > { %p2311_p12 = pnand %p2310_p5, %p2304_p6 }
  0xec   : > { %2314 = shalt.err (!%p2311_p12)
}
  0xed   : > { %s2315_s3 = scalar_lea.vmem %s2845_s25, 128  ;;  %s2448_s2 = smov [#allocation14]  }
  0xee   : > { %p2316_p13 = scmp.ne.s32.totalorder %s2845_s25, %s2315_s3  ;;  %s2320_s4 = sshll.u32 %s2448_s2, 4  ;;  %s2321_s4 = int_to_ptr.vmem [resolvable:$false] %s2320_s4 }
  0xef   : > { %s2322_s16 = scalar_lea.vmem %s2321_s4, 256  ;;  %p2323_p8 = scmp.lt.s32.totalorder %s2845_s25, %s2321_s4 }
  0xf0   : > { %p2318_p3 = pnand %p2316_p13, %p3165_p9  ;;  %p2324_p0 = scmp.lt.s32.totalorder %s2322_s16, %s2315_s3 }
  0xf2   : > { %p2319_p11 = pneg %p2318_p3  ;;  %p2325_p1 = por %p2324_p0, %p2323_p8 }
  0xf4   : > { %p2326_p7 = pnand %p2325_p1, %p2319_p11 }
  0xf6   : > { %2329 = shalt.err (!%p2326_p7)
}
  0xf7   : > { %p3166_p6 = scmp.ne.s32.totalorder %s3130_s24, 0  ;;  %s3167_s21 = scalar_lea.sflag [#allocation13], %s2572_s22 }
  0xf8   : > { %p3168_p4 = scmp.ne.s32.totalorder %s3136_s9, 0 }
  0xf9   : > { %1939 = dma.hbm_to_vmem [thread:$0]  (!%p3166_p6), %s2776_s14, 128, %s2845_s25, %s3167_s21  }
  0xfa   : > { %469 = sbr.rel (%p3168_p4) target bundleno = 1242 (0x4da), region = 56  ;;  %s3169_s8 = sld [smem:[#allocation22_spill]] (!%p3168_p4) }
  0xfb   : > { %s3170_s20 = sld [smem:[#allocation27_spill]] (!%p3168_p4) }
 0x100   : > { %s2898_s15 = sand.u32 (!%p3168_p4), 1, %s3169_s8  }
 0x101   : > { %s1773_s27 = sshll.u32 %s2898_s15, 3  ;;  %s472_s1 = scalar_lea.sflag [#allocation5], %s2898_s15 }
 0x102   : > { %s2904_s30 = scalar_lea.vmem [#allocation4], %s1773_s27  ;;  %p3171_p9 = scmp.ne.s32.totalorder %s3170_s20, 0 }
 0x104   : > { %2375 = dma.done.wait (%p3171_p9), %s472_s1, 128  }
 0x105   : > { %2377 = vsyncadd (%p3171_p9), %s472_s1, 4294967168  ;;  %s3172_s22 = sadd.s32 4294967295, %s2436_s19   ;;  %s1774_s9 = sshll.u32 %s2898_s15, 2 }
 0x106   : > { %s480_s24 = sand.u32 1, %s3172_s22   ;;  %s2913_s25 = scalar_lea.vmem [#allocation6], %s1774_s9 }
 0x107   : > { %s481_s14 = scalar_lea.sflag [#allocation7], %s480_s24 }
 0x108   : > { %2379 = dma.done.wait (%p3171_p9), %s481_s14, 64  }
 0x109   : > { %2381 = vsyncadd (%p3171_p9), %s481_s14, 4294967232  ;;  %s3173_s13 = sld [smem:[#allocation20_spill]]  ;;  %s3174_s12 = sld [smem:[#allocation29_spill]] }
 0x10f   : > { %s491_s11 = sand.u32 1, %s3173_s13   ;;  %p3175_p10 = scmp.ne.s32.totalorder %s3174_s12, 0 }
 0x110   : > { %s1775_s28 = sshll.u32 %s491_s11, 8 }
 0x111   : > { %s2920_s26 = scalar_lea.vmem [#allocation8], %s1775_s28 }
 0x112   : > { %2383 = dma.done.wait (%p3175_p10), %s481_s14, 4096  }
 0x113   : > { %2385 = vsyncadd (%p3175_p10), %s481_s14, 4294963200  ;;  %s499_s6 = scalar_lea.sflag [#allocation10], %s480_s24  ;;  %s2926_s23 = scalar_lea.vmem [#allocation9], %s491_s11 }
 0x114   : > { %2387 = dma.done.wait (%p3175_p10), %s499_s6, 4112  }
 0x115   : > { %2389 = vsyncadd (%p3175_p10), %s499_s6, 4294963184  ;;  %s2932_s0 = scalar_lea.vmem [#allocation11], %s1775_s28  ;;  %s516_s29 = scalar_lea.sflag [#allocation13], %s480_s24 }
 0x116   : > { %s2934_s10 = scalar_lea.vmem [#allocation12], %s1774_s9 }
 0x117   : > { %2391 = dma.done.wait (%p3171_p9), %s516_s29, 192  }
 0x118   : > { %2393 = vsyncadd (%p3171_p9), %s516_s29, 4294967104  ;;  %s3176_s3 = sld [smem:[#allocation25_spill]]  ;;  %s3177_s2 = sld [smem:[#allocation24_spill]] }
 0x119   : > { %s3178_s21 = sld [smem:[#allocation38_spill]]  ;;  %s2952_s1 = scalar_lea.vmem [#allocation14], %s1773_s27 }
 0x11e   : > { %p591_p2 = scmp.lt.s32.totalorder %s3176_s3, 7  ;;  %p595_p5 = scmp.eq.s32.totalorder %s3176_s3, 0 }
 0x11f   : > { %p596_p12 = scmp.eq.s32.totalorder %s3177_s2, 0 }
 0x120   : > { %s3205_s3 = smov (!%p591_p2, %s3176_s3), 7 }
 0x121   : > { %p597_p13 = pnand %p596_p12, %p595_p5  ;;  %s593_s8 = scalar_lea.vmem %s3178_s21, %s3205_s3 }
 0x122   : > { %s3179_s24 = sld [smem:[#allocation32_spill]] (!%p597_p13)  ;;  %vm602_vm0 = vcmask (!%p597_p13), 31744   ;;  %s3180_s13 = sld [smem:[#allocation39_spill]] (!%p597_p13) }
 0x123   : > { %600 = sbr.rel (%p597_p13) target bundleno = 298 (0x12a), region = 88 }
 0x128   : > { %v601_v0 = vld [vmem:[%s3179_s24] sm:$0xff] (!%p597_p13) }
 0x129   : > { %603 = vst.msk [vmem:[%s3180_s13] sm:$0xff] (!%p597_p13), %vm602_vm0, %v601_v0 }
 0x12a PF: > { %s3181_s12 = sld [smem:[#allocation24_spill]] }
 0x130   : > { %p1779_p3 = scmp.ne.s32.totalorder %s3181_s12, 0 }
 0x131   : > { %v609_v1 = vld [vmem:[%s2904_s30] sm:$0xff] (!%p1779_p3)  ;;  %v612_v2 = vlaneseq (!%p1779_p3)  ;;  %v2449_v3 = vmov (!%p1779_p3), 1983009808   ;;  %v2450_v5 = vmov (!%p1779_p3), 0   ;;  %vm654_vm1 = vcmask (!%p1779_p3), 1041408   ;;  %s3182_s11 = sld [smem:[#allocation39_spill]] (!%p1779_p3) }
 0x132   : > { %606 = sbr.rel (%p1779_p3) target bundleno = 538 (0x21a), region = 92  ;;  %v635_v4 = vunpack.c.l.s4 (!%p1779_p3), %v2449_v3  ;;  %699 = vmatprep.mubr.bf16.mxu0 (!%p1779_p3), %v2450_v5  ;;  %740 = vmatprep.mubr.bf16.mxu1 (!%p1779_p3), %v2450_v5  ;;  %v633_v8 = vcombine.high (!%p1779_p3), %v609_v1, %v609_v1  ;;  %vm650_vm2 = vcmask (!%p1779_p3), 31744   ;;  %v2451_v18 = vmov (!%p1779_p3), 0.0   ;;  %v610_v21 = vld [vmem:[%s2913_s25] sm:$0xf] (!%p1779_p3) }
 0x133   : > { %v613_v6 = vshrl.u32 (!%p1779_p3), %v612_v2, 7  ;;  %757 = vst [vmem:[#allocation3] sm:$0xff] (!%p1779_p3), %v2451_v18  ;;  %758 = vst [vmem:[#allocation3 + $0x8] sm:$0xff] (!%p1779_p3), %v2451_v18 }
 0x134   : > { %v636_v7 = vunpack.c.0.s8 (!%p1779_p3), %v635_v4  ;;  %759 = vst [vmem:[#allocation3 + $0x10] sm:$0xff] (!%p1779_p3), %v2451_v18  ;;  %760 = vst [vmem:[#allocation3 + $0x18] sm:$0xff] (!%p1779_p3), %v2451_v18 }
 0x135   : > { %v614_v19 = vsub.s32 (!%p1779_p3), 0, %v613_v6  ;;  %v622_v20 = vsub.s32 (!%p1779_p3), 2, %v613_v6  ;;  %v618_v22 = vsub.s32 (!%p1779_p3), 1, %v613_v6  ;;  %v626_v23 = vsub.s32 (!%p1779_p3), 3, %v613_v6 }
 0x136   : > { %v639_v9 = vsub.s32 (!%p1779_p3), %v636_v7, %v613_v6 }
 0x137   : > { %v607_v12 = vld [vmem:[%s3182_s11] sm:$0xff] (!%p1779_p3)  ;;  %v615_v24 = vrot.slane (!%p1779_p3), %v610_v21, %v614_v19  ;;  %v623_v25 = vrot.slane (!%p1779_p3), %v610_v21, %v622_v20  ;;  %v619_v26 = vrot.slane (!%p1779_p3), %v610_v21, %v618_v22  ;;  %v627_v27 = vrot.slane (!%p1779_p3), %v610_v21, %v626_v23 }
 0x138   : > { %v640_v10 = vrot.slane (!%p1779_p3), %v609_v1, %v639_v9  ;;  %v647_v11 = vrot.slane (!%p1779_p3), %v633_v8, %v639_v9  ;;  %v608_v17 = vpack.c.bf16 (!%p1779_p3), %v607_v12, %v607_v12 }
 0x13a   : > { %v648_v13 = vcombine.high %v640_v10, %v640_v10  ;;  %v649_v14 = vcombine.high %v647_v11, %v647_v11  ;;  %v656_v15 = vsel %vm654_vm1, %v640_v10, 0  ;;  %v662_v16 = vsel %vm654_vm1, %v647_v11, 0 }
 0x13c   : > { %1780 = vmatprep.subr.msk.bf16.mxu0 %vm654_vm1, %v648_v13  ;;  %1782 = vmatprep.subr.msk.bf16.mxu1 %vm654_vm1, %v649_v14 }
 0x13d   : > { %668 = vmatpush1.bf16.msra.mxu0 %v656_v15  ;;  %709 = vmatpush1.bf16.msra.mxu1 %v662_v16 }
 0x140   : > { %1781 = vmatmul.mubr.msk.bf16.vlgmr.msra.gmra.mrb[0].mxu0 %vm650_vm2, %v608_v17  ;;  %1783 = vmatmul.mubr.msk.bf16.vlgmr.msra.gmra.mrb[0].mxu1 %vm650_vm2, %v608_v17 }
 0x213   : > { %v701_v28 = vpop.f32.mrb[0].mxu0  ;;  %v742_v29 = vpop.f32.mrb[0].mxu1 }
 0x214   : > { %v702_v30 = vadd.f32 %v701_v28, %v615_v24  ;;  %v743_v31 = vadd.f32 %v742_v29, %v623_v25  ;;  %v703_v32 = vpop.f32.mrb[1].mxu0  ;;  %v744_v33 = vpop.f32.mrb[1].mxu1 }
 0x215   : > { %v704_v34 = vadd.f32 %v703_v32, %v619_v26  ;;  %v745_v35 = vadd.f32 %v744_v33, %v627_v27  ;;  %v705_v36 = vpop.f32.mrb[2].mxu0  ;;  %v746_v37 = vpop.f32.mrb[2].mxu1 }
 0x216   : > { %v749_v38 = vmax.f32 %v702_v30, 0.0  ;;  %v751_v39 = vmax.f32 %v743_v31, 0.0  ;;  %v706_v40 = vpop.f32.mrb[3].mxu0  ;;  %v747_v41 = vpop.f32.mrb[3].mxu1 }
 0x217   : > { %v750_v42 = vmax.f32 %v704_v34, 0.0  ;;  %v752_v43 = vmax.f32 %v745_v35, 0.0 }
 0x218   : > { %753 = vst [vmem:[#allocation2] sm:$0xff] %v749_v38  ;;  %755 = vst [vmem:[#allocation2 + $0x10] sm:$0xff] %v751_v39 }
 0x219   : > { %754 = vst [vmem:[#allocation2 + $0x8] sm:$0xff] %v750_v42  ;;  %756 = vst [vmem:[#allocation2 + $0x18] sm:$0xff] %v752_v43 }
 0x21a PF: > { %v2039_v44 = vld [vmem:[%s2920_s26 + $0x40] sm:$0xff]   ;;  %v2043_v48 = vld [vmem:[%s2920_s26 + $0x48] sm:$0xff]   ;;  %v2047_v52 = vld [vmem:[%s2920_s26 + $0x50] sm:$0xff]   ;;  %s3183_s30 = sld [smem:[#allocation24_spill]] }
 0x21b   : > { %v2040_v45 = vld [vmem:[%s2920_s26 + $0xc0] sm:$0xff]   ;;  %1858 = vmatprep.subr.bf16.mxu0 %v2039_v44  ;;  %v2044_v49 = vld [vmem:[%s2920_s26 + $0xc8] sm:$0xff]   ;;  %v2048_v53 = vld [vmem:[%s2920_s26 + $0xd0] sm:$0xff]  }
 0x21c   : > { %v2041_v46 = vld [vmem:[%s2920_s26] sm:$0xff]   ;;  %1880 = vmatprep.subr.bf16.mxu1 %v2040_v45  ;;  %v2045_v50 = vld [vmem:[%s2920_s26 + $0x8] sm:$0xff]   ;;  %v2049_v54 = vld [vmem:[%s2920_s26 + $0x10] sm:$0xff]  }
 0x21d   : > { %v2042_v47 = vld [vmem:[%s2920_s26 + $0x80] sm:$0xff]   ;;  %1859 = vmatpush3.bf16.msra.mxu0 %v2041_v46  ;;  %v2046_v51 = vld [vmem:[%s2920_s26 + $0x88] sm:$0xff]   ;;  %v2050_v55 = vld [vmem:[%s2920_s26 + $0x90] sm:$0xff]  }
 0x21e   : > { %1881 = vmatpush3.bf16.msra.mxu1 %v2042_v47  ;;  %1860 = vmatprep.subr.bf16.mxu0 %v2043_v48  ;;  %v2051_v56 = vld [vmem:[%s2920_s26 + $0x58] sm:$0xff]   ;;  %v2055_v60 = vld [vmem:[%s2920_s26 + $0x60] sm:$0xff]   ;;  %v2059_v0 = vld [vmem:[%s2920_s26 + $0x68] sm:$0xff]  }
 0x21f   : > { %1882 = vmatprep.subr.bf16.mxu1 %v2044_v49  ;;  %v2052_v57 = vld [vmem:[%s2920_s26 + $0xd8] sm:$0xff]   ;;  %v2056_v61 = vld [vmem:[%s2920_s26 + $0xe0] sm:$0xff]   ;;  %v2060_v1 = vld [vmem:[%s2920_s26 + $0xe8] sm:$0xff]  }
 0x220   : > { %v2053_v58 = vld [vmem:[%s2920_s26 + $0x18] sm:$0xff]   ;;  %v2057_v62 = vld [vmem:[%s2920_s26 + $0x20] sm:$0xff]   ;;  %v2061_v2 = vld [vmem:[%s2920_s26 + $0x28] sm:$0xff]   ;;  %p1849_p11 = scmp.ne.s32.totalorder %s3183_s30, 3 }
 0x221   : > { %1861 = vmatpush3.bf16.msra.mxu0 %v2045_v50  ;;  %v2054_v59 = vld [vmem:[%s2920_s26 + $0x98] sm:$0xff]   ;;  %v2058_v63 = vld [vmem:[%s2920_s26 + $0xa0] sm:$0xff]   ;;  %v2062_v3 = vld [vmem:[%s2920_s26 + $0xa8] sm:$0xff]   ;;  %vm1552_vm3 = vcmask (!%p1849_p11), 31744  }
 0x222   : > { %1883 = vmatpush3.bf16.msra.mxu1 %v2046_v51  ;;  %1862 = vmatprep.subr.bf16.mxu0 %v2047_v52  ;;  %v2063_v4 = vld [vmem:[%s2920_s26 + $0x70] sm:$0xff]   ;;  %v2067_v8 = vld [vmem:[%s2920_s26 + $0x78] sm:$0xff]   ;;  %v764_v13 = vld [vmem:[#allocation2 + $0x18] sm:$0xff]  ;;  %v2452_v52 = vmov 0  }
 0x223   : > { %1884 = vmatprep.subr.bf16.mxu1 %v2048_v53  ;;  %v2064_v5 = vld [vmem:[%s2920_s26 + $0xf0] sm:$0xff]   ;;  %v2068_v9 = vld [vmem:[%s2920_s26 + $0xf8] sm:$0xff]   ;;  %v761_v14 = vld [vmem:[#allocation2] sm:$0xff]  ;;  %v768_v16 = vpack.c.bf16 %v764_v13, %v764_v13 }
 0x224   : > { %v2065_v6 = vld [vmem:[%s2920_s26 + $0x30] sm:$0xff]   ;;  %v2069_v10 = vld [vmem:[%s2920_s26 + $0x38] sm:$0xff]   ;;  %v765_v17 = vpack.c.bf16 %v761_v14, %v761_v14 }
 0x225   : > { %1863 = vmatpush3.bf16.msra.mxu0 %v2049_v54  ;;  %v2066_v7 = vld [vmem:[%s2920_s26 + $0xb0] sm:$0xff]   ;;  %v2070_v11 = vld [vmem:[%s2920_s26 + $0xb8] sm:$0xff]   ;;  %1104 = vmatprep.mubr.bf16.mxu1 %v768_v16 }
 0x226   : > { %1885 = vmatpush3.bf16.msra.mxu1 %v2050_v55  ;;  %1864 = vmatprep.subr.bf16.mxu0 %v2051_v56  ;;  %v762_v12 = vld [vmem:[#allocation2 + $0x8] sm:$0xff]  ;;  %v763_v18 = vld [vmem:[#allocation2 + $0x10] sm:$0xff]  ;;  %v1784_v55 = vld [vmem:[%s2926_s23] ss:$0 sm:$0xff] }
 0x227   : > { %1886 = vmatprep.subr.bf16.mxu1 %v2052_v57  ;;  %v766_v15 = vpack.c.bf16 %v762_v12, %v762_v12  ;;  %v767_v19 = vpack.c.bf16 %v763_v18, %v763_v18  ;;  %v2071_v20 = vld [vmem:[%s2932_s0] ss:$16 sps:$4 sm:$0xff]   ;;  %v2073_v21 = vld [vmem:[%s2932_s0 + $0x4] ss:$16 sps:$4 sm:$0xff]   ;;  %v2074_v22 = vld [vmem:[%s2932_s0 + $0x8] ss:$16 sps:$4 sm:$0xff]  }
 0x228   : > { %v2076_v23 = vld [vmem:[%s2932_s0 + $0xc] ss:$16 sps:$4 sm:$0xff]   ;;  %v2077_v24 = vld [vmem:[%s2932_s0 + $0x20] ss:$16 sps:$4 sm:$0xff]   ;;  %v2079_v25 = vld [vmem:[%s2932_s0 + $0x24] ss:$16 sps:$4 sm:$0xff]  }
 0x229   : > { %1865 = vmatpush3.bf16.msra.mxu0 %v2053_v58  ;;  %1064 = vmatprep.mubr.bf16.mxu0 %v766_v15  ;;  %v2080_v26 = vld [vmem:[%s2932_s0 + $0x28] ss:$16 sps:$4 sm:$0xff]   ;;  %v2082_v27 = vld [vmem:[%s2932_s0 + $0x2c] ss:$16 sps:$4 sm:$0xff]   ;;  %v2085_v28 = vld [vmem:[%s2932_s0 + $0x44] ss:$16 sps:$4 sm:$0xff]  }
 0x22a   : > { %1887 = vmatpush3.bf16.msra.mxu1 %v2054_v59  ;;  %1866 = vmatprep.subr.bf16.mxu0 %v2055_v60  ;;  %v2088_v29 = vld [vmem:[%s2932_s0 + $0x4c] ss:$16 sps:$4 sm:$0xff]   ;;  %v2083_v30 = vld [vmem:[%s2932_s0 + $0x40] ss:$16 sps:$4 sm:$0xff]   ;;  %v2086_v31 = vld [vmem:[%s2932_s0 + $0x48] ss:$16 sps:$4 sm:$0xff]  }
 0x22b   : > { %1888 = vmatprep.subr.bf16.mxu1 %v2056_v61  ;;  %v2091_v32 = vld [vmem:[%s2932_s0 + $0x64] ss:$16 sps:$4 sm:$0xff]   ;;  %v2094_v33 = vld [vmem:[%s2932_s0 + $0x6c] ss:$16 sps:$4 sm:$0xff]   ;;  %v2089_v34 = vld [vmem:[%s2932_s0 + $0x60] ss:$16 sps:$4 sm:$0xff]  }
 0x22c   : > { %v2092_v35 = vld [vmem:[%s2932_s0 + $0x68] ss:$16 sps:$4 sm:$0xff]   ;;  %v2097_v36 = vld [vmem:[%s2932_s0 + $0x84] ss:$16 sps:$4 sm:$0xff]   ;;  %v2100_v37 = vld [vmem:[%s2932_s0 + $0x8c] ss:$16 sps:$4 sm:$0xff]  }
 0x22d   : > { %1867 = vmatpush3.bf16.msra.mxu0 %v2057_v62  ;;  %v2095_v38 = vld [vmem:[%s2932_s0 + $0x80] ss:$16 sps:$4 sm:$0xff]   ;;  %v2098_v39 = vld [vmem:[%s2932_s0 + $0x88] ss:$16 sps:$4 sm:$0xff]   ;;  %v2103_v40 = vld [vmem:[%s2932_s0 + $0xa4] ss:$16 sps:$4 sm:$0xff]  }
 0x22e   : > { %1889 = vmatpush3.bf16.msra.mxu1 %v2058_v63  ;;  %1868 = vmatprep.subr.bf16.mxu0 %v2059_v0  ;;  %v2106_v41 = vld [vmem:[%s2932_s0 + $0xac] ss:$16 sps:$4 sm:$0xff]   ;;  %v2101_v42 = vld [vmem:[%s2932_s0 + $0xa0] ss:$16 sps:$4 sm:$0xff]   ;;  %v2104_v43 = vld [vmem:[%s2932_s0 + $0xa8] ss:$16 sps:$4 sm:$0xff]  }
 0x22f   : > { %1890 = vmatprep.subr.bf16.mxu1 %v2060_v1  ;;  %v2109_v44 = vld [vmem:[%s2932_s0 + $0xc4] ss:$16 sps:$4 sm:$0xff]   ;;  %v2112_v45 = vld [vmem:[%s2932_s0 + $0xcc] ss:$16 sps:$4 sm:$0xff]   ;;  %v2107_v46 = vld [vmem:[%s2932_s0 + $0xc0] ss:$16 sps:$4 sm:$0xff]  }
 0x230   : > { %v2110_v47 = vld [vmem:[%s2932_s0 + $0xc8] ss:$16 sps:$4 sm:$0xff]   ;;  %v2115_v48 = vld [vmem:[%s2932_s0 + $0xe4] ss:$16 sps:$4 sm:$0xff]   ;;  %v2118_v49 = vld [vmem:[%s2932_s0 + $0xec] ss:$16 sps:$4 sm:$0xff]  }
 0x231   : > { %1869 = vmatpush3.bf16.msra.mxu0 %v2061_v2  ;;  %v2113_v50 = vld [vmem:[%s2932_s0 + $0xe0] ss:$16 sps:$4 sm:$0xff]   ;;  %v2116_v51 = vld [vmem:[%s2932_s0 + $0xe8] ss:$16 sps:$4 sm:$0xff]   ;;  %s3185_s0 = sld [smem:[#allocation39_spill]] (!%p1849_p11) }
 0x232   : > { %1891 = vmatpush3.bf16.msra.mxu1 %v2062_v3  ;;  %1870 = vmatprep.subr.bf16.mxu0 %v2063_v4  ;;  %v1114_v4 = vld [vmem:[#allocation3] sm:$0xff] }
 0x233   : > { %1892 = vmatprep.subr.bf16.mxu1 %v2064_v5  ;;  %v1116_v5 = vld [vmem:[#allocation3 + $0x10] sm:$0xff] }
 0x235   : > { %1871 = vmatpush3.bf16.msra.mxu0 %v2065_v6  ;;  %v1115_v6 = vld [vmem:[#allocation3 + $0x8] sm:$0xff] }
 0x236   : > { %1893 = vmatpush3.bf16.msra.mxu1 %v2066_v7  ;;  %1872 = vmatprep.subr.bf16.mxu0 %v2067_v8  ;;  %v1117_v7 = vld [vmem:[#allocation3 + $0x18] sm:$0xff] }
 0x237   : > { %1894 = vmatprep.subr.bf16.mxu1 %v2068_v9 }
 0x239   : > { %1873 = vmatpush3.bf16.msra.mxu0 %v2069_v10 }
 0x23a   : > { %1895 = vmatpush3.bf16.msra.mxu1 %v2070_v11  ;;  %1310 = vmatprep.subr.bf16.mxu0 %v2073_v21  ;;  %v1442_v21 = vld [vmem:[%s2952_s1] sm:$0xff] (!%p1849_p11) }
 0x23b   : > { %1351 = vmatprep.subr.bf16.mxu1 %v2076_v23 }
 0x23c   : > { %1065 = vmatmul.mubr.bf16.vlgmr.msra.gmra.mrb[0].mxu0 %v765_v17 }
 0x23d   : > { %1105 = vmatmul.mubr.bf16.vlgmr.msra.gmra.mrb[0].mxu1 %v767_v19  ;;  %1311 = vmatpush1.bf16.msra.mxu0 %v2071_v20  ;;  %v1410_v20 = vlaneseq (!%p1849_p11) }
 0x23e   : > { %1352 = vmatpush1.bf16.msra.mxu1 %v2074_v22  ;;  %1312 = vmatprep.subr.bf16.mxu0 %v2079_v25  ;;  %v2453_v22 = vmov (!%p1849_p11), 1983009808  }
 0x23f   : > { %1353 = vmatprep.subr.bf16.mxu1 %v2082_v27  ;;  %1342 = vmatprep.mubr.bf16.mxu0 %v2452_v52  ;;  %v1453_v23 = vunpack.c.l.s4 (!%p1849_p11), %v2453_v22  ;;  %v1408_v27 = vld [vmem:[%s2934_s10] sm:$0xf] (!%p1849_p11) }
 0x240   : > { %1383 = vmatprep.mubr.bf16.mxu1 %v2452_v52 }
 0x241   : > { %1313 = vmatpush1.bf16.msra.mxu0 %v2077_v24  ;;  %v1411_v24 = vshrl.u32 (!%p1849_p11), %v1410_v20, 7  ;;  %v1454_v25 = vunpack.c.0.s8 (!%p1849_p11), %v1453_v23 }
 0x242   : > { %1354 = vmatpush1.bf16.msra.mxu1 %v2080_v26  ;;  %1314 = vmatprep.subr.bf16.mxu0 %v2085_v28  ;;  %v1451_v26 = vcombine.high (!%p1849_p11), %v1442_v21, %v1442_v21 }
 0x243   : > { %1355 = vmatprep.subr.bf16.mxu1 %v2088_v29  ;;  %v1416_v29 = vsub.s32 (!%p1849_p11), 1, %v1411_v24 }
 0x245   : > { %1315 = vmatpush1.bf16.msra.mxu0 %v2083_v30  ;;  %v1424_v30 = vsub.s32 (!%p1849_p11), 3, %v1411_v24 }
 0x246   : > { %1356 = vmatpush1.bf16.msra.mxu1 %v2086_v31  ;;  %1316 = vmatprep.subr.bf16.mxu0 %v2091_v32  ;;  %v1412_v31 = vsub.s32 (!%p1849_p11), 0, %v1411_v24  ;;  %v1420_v32 = vsub.s32 (!%p1849_p11), 2, %v1411_v24 }
 0x247   : > { %1357 = vmatprep.subr.bf16.mxu1 %v2094_v33  ;;  %v1457_v33 = vsub.s32 (!%p1849_p11), %v1454_v25, %v1411_v24 }
 0x249   : > { %1317 = vmatpush1.bf16.msra.mxu0 %v2089_v34 }
 0x24a   : > { %1358 = vmatpush1.bf16.msra.mxu1 %v2092_v35  ;;  %1318 = vmatprep.subr.bf16.mxu0 %v2097_v36 }
 0x24b   : > { %1359 = vmatprep.subr.bf16.mxu1 %v2100_v37  ;;  %v1417_v37 = vrot.slane (!%p1849_p11), %v1408_v27, %v1416_v29 }
 0x24d   : > { %1319 = vmatpush1.bf16.msra.mxu0 %v2095_v38  ;;  %v1425_v38 = vrot.slane (!%p1849_p11), %v1408_v27, %v1424_v30 }
 0x24e   : > { %1360 = vmatpush1.bf16.msra.mxu1 %v2098_v39  ;;  %1320 = vmatprep.subr.bf16.mxu0 %v2103_v40  ;;  %v1413_v39 = vrot.slane (!%p1849_p11), %v1408_v27, %v1412_v31  ;;  %v1421_v40 = vrot.slane (!%p1849_p11), %v1408_v27, %v1420_v32 }
 0x24f   : > { %1361 = vmatprep.subr.bf16.mxu1 %v2106_v41  ;;  %v1458_v41 = vrot.slane (!%p1849_p11), %v1442_v21, %v1457_v33 }
 0x251   : > { %1321 = vmatpush1.bf16.msra.mxu0 %v2101_v42  ;;  %v1465_v42 = vrot.slane (!%p1849_p11), %v1451_v26, %v1457_v33 }
 0x252   : > { %1362 = vmatpush1.bf16.msra.mxu1 %v2104_v43  ;;  %1322 = vmatprep.subr.bf16.mxu0 %v2109_v44 }
 0x253   : > { %1363 = vmatprep.subr.bf16.mxu1 %v2112_v45 }
 0x255   : > { %1323 = vmatpush1.bf16.msra.mxu0 %v2107_v46 }
 0x256   : > { %1364 = vmatpush1.bf16.msra.mxu1 %v2110_v47  ;;  %1324 = vmatprep.subr.bf16.mxu0 %v2115_v48  ;;  %v1466_v47 = vcombine.high (!%p1849_p11), %v1458_v41, %v1458_v41  ;;  %v1467_v48 = vcombine.high (!%p1849_p11), %v1465_v42, %v1465_v42 }
 0x257   : > { %1365 = vmatprep.subr.bf16.mxu1 %v2118_v49 }
 0x259   : > { %1325 = vmatpush1.bf16.msra.mxu0 %v2113_v50 }
 0x25a   : > { %1366 = vmatpush1.bf16.msra.mxu1 %v2116_v51  ;;  %1512 = vmatprep.subr.bf16.mxu0 (!%p1849_p11), %v1467_v48 }
 0x25b   : > { %1472 = vmatprep.subr.bf16.mxu1 (!%p1849_p11), %v1466_v47 }
 0x30f   : > { %v1874_v53 = vpop.f32.mrb[0].mxu0 }
 0x310   : > { %v1896_v54 = vpop.f32.mrb[0].mxu1  ;;  %v1875_v56 = vpop.f32.mrb[1].mxu0 }
 0x311   : > { %v1897_v57 = vpop.f32.mrb[1].mxu1  ;;  %v1876_v58 = vadd.f32 %v1875_v56, %v1874_v53  ;;  %v1877_v60 = vpop.f32.mrb[2].mxu0 }
 0x312   : > { %v1898_v59 = vadd.f32 %v1897_v57, %v1896_v54  ;;  %v1899_v61 = vpop.f32.mrb[2].mxu1  ;;  %v1878_v62 = vpop.f32.mrb[3].mxu0  ;;  %v1850_v57 = vld [vmem:[%s593_s8] ss:$0 sm:$0xff] (!%p1849_p11) }
 0x313   : > { %v1900_v63 = vpop.f32.mrb[3].mxu1  ;;  %v1067_v0 = vadd.f32 %v1876_v58, %v1784_v55 }
 0x315   : > { %v1107_v1 = vadd.f32 %v1898_v59, %v1067_v0 }
 0x317   : > { %v1112_v2 = vmax.f32 %v1107_v1, 0.0 }
 0x319   : > { %v1113_v3 = vpack.c.bf16 %v1112_v2, %v1112_v2 }
 0x31b   : > { %1343 = vmatmul.mubr.bf16.vlgmr.msra.gmra.mrb[4].mxu0 %v1113_v3  ;;  %1384 = vmatmul.mubr.bf16.vlgmr.msra.gmra.mrb[4].mxu1 %v1113_v3 }
 0x31c   : > { %1473 = vmatpush1.bf16.xpose.msra.mxu1 (!%p1849_p11), %v1458_v41  ;;  %1513 = vmatpush1.bf16.xpose.msra.mxu0 (!%p1849_p11), %v1465_v42 }
 0x3ec   : > { %1403 = sbr.rel (%p1849_p11) target bundleno = 1242 (0x4da), region = 96 }
 0x3ee   : > { %v1344_v8 = vpop.f32.mrb[4].mxu0  ;;  %v1385_v9 = vpop.f32.mrb[4].mxu1 }
 0x3ef   : > { %v1392_v10 = vadd.f32 %v1344_v8, %v1114_v4  ;;  %v1394_v11 = vadd.f32 %v1385_v9, %v1116_v5  ;;  %v1346_v12 = vpop.f32.mrb[5].mxu0  ;;  %v1387_v13 = vpop.f32.mrb[5].mxu1 }
 0x3f0   : > { %v1393_v14 = vadd.f32 %v1346_v12, %v1115_v6  ;;  %v1395_v15 = vadd.f32 %v1387_v13, %v1117_v7  ;;  %v1348_v16 = vpop.f32.mrb[6].mxu0  ;;  %v1389_v17 = vpop.f32.mrb[6].mxu1 }
 0x3f1   : > { %1396 = vst [vmem:[#allocation3] sm:$0xff] %v1392_v10  ;;  %1398 = vst [vmem:[#allocation3 + $0x10] sm:$0xff] %v1394_v11  ;;  %v1349_v18 = vpop.f32.mrb[7].mxu0  ;;  %v1390_v19 = vpop.f32.mrb[7].mxu1 }
 0x3f2   : > { %1397 = vst [vmem:[#allocation3 + $0x8] sm:$0xff] %v1393_v14  ;;  %1399 = vst [vmem:[#allocation3 + $0x18] sm:$0xff] %v1395_v15 }
 0x3f8   : > { %v1404_v35 = vld [vmem:[#allocation3] sm:$0xff]  ;;  %v1406_v36 = vld [vmem:[#allocation3 + $0x10] sm:$0xff] }
 0x3f9   : > { %v1405_v28 = vld [vmem:[#allocation3 + $0x8] sm:$0xff]  ;;  %v1407_v34 = vld [vmem:[#allocation3 + $0x18] sm:$0xff]  ;;  %v1430_v45 = vadd.f32 %v1413_v39, %v1404_v35  ;;  %v1432_v46 = vadd.f32 %v1421_v40, %v1406_v36 }
 0x3fa   : > { %v1431_v43 = vadd.f32 %v1417_v37, %v1405_v28  ;;  %v1433_v44 = vadd.f32 %v1425_v38, %v1407_v34 }
 0x3fb   : > { %v1434_v51 = vmax.f32 %v1430_v45, 0.0  ;;  %v1436_v52 = vmax.f32 %v1432_v46, 0.0 }
 0x3fc   : > { %v1435_v49 = vmax.f32 %v1431_v43, 0.0  ;;  %v1437_v50 = vmax.f32 %v1433_v44, 0.0 }
 0x3fd   : > { %v1438_v55 = vpack.c.bf16 %v1434_v51, %v1434_v51  ;;  %v1440_v56 = vpack.c.bf16 %v1436_v52, %v1436_v52 }
 0x3fe   : > { %v1439_v53 = vpack.c.bf16 %v1435_v49, %v1435_v49  ;;  %v1441_v54 = vpack.c.bf16 %v1437_v50, %v1437_v50 }
 0x400   : > { %1504 = vmatprep.mubr.bf16.mxu1 %v1439_v53  ;;  %1544 = vmatprep.mubr.bf16.mxu0 %v1441_v54 }
 0x401   : > { %1505 = vmatmul.mubr.bf16.vlgmr.msra.gmra.mrb[0].mxu1 %v1438_v55  ;;  %1545 = vmatmul.mubr.bf16.vlgmr.msra.gmra.mrb[0].mxu0 %v1440_v56 }
 0x4d4   : > { %v1506_v58 = vpop.f32.mrb[0].mxu1  ;;  %v1546_v59 = vpop.f32.mrb[0].mxu0 }
 0x4d5   : > { %v1507_v60 = vadd.f32 %v1850_v57, %v1506_v58  ;;  %v1508_v61 = vpop.f32.mrb[1].mxu1  ;;  %v1548_v62 = vpop.f32.mrb[1].mxu0 }
 0x4d6   : > { %v1509_v63 = vpop.f32.mrb[2].mxu1  ;;  %v1549_v0 = vpop.f32.mrb[2].mxu0 }
 0x4d7   : > { %v1547_v1 = vadd.f32 %v1546_v59, %v1507_v60  ;;  %v1510_v2 = vpop.f32.mrb[3].mxu1  ;;  %v1550_v3 = vpop.f32.mrb[3].mxu0 }
 0x4d9   : > { %1553 = vst.msk [vmem:[%s3185_s0] sm:$0xff] %vm1552_vm3, %v1547_v1 }
 0x4da PF: > { %s31_s19 = sadd.s32 1, %s2436_s19   ;;  %s3186_s30 = sld [smem:[#allocation20_spill]] }
 0x4db   : > { %p28_p8 = scmp.ge.s32.totalorder %s31_s19, 34   ;;  %s3187_s10 = sld [smem:[#allocation21_spill]] }
 0x4dc   : > { %s3188_s11 = sld [smem:[#allocation31_spill]]  ;;  %s3189_s12 = sld [smem:[#allocation22_spill]] }
 0x4dd   : > { %s3190_s13 = sld [smem:[#allocation23_spill]]  ;;  %s3191_s14 = sld [smem:[#allocation30_spill]] }
 0x4de   : > { %s3192_s29 = sld [smem:[#allocation26_spill]]  ;;  %s3193_s3 = sld [smem:[#allocation28_spill]] }
 0x4df   : > { %s3194_s15 = smov %s2428_s17  ;;  %s3195_s16 = smov %s2432_s18 }
 0x4e0   :  { %30 = sbr.rel (!%p28_p8) target bundleno = 22 (0x16), region = 179 }
 0x4e4   : > { %s3196_s17 = smov %s3192_s29  ;;  %s3197_s18 = smov %s3193_s3 }
 0x4e7   :  { %1565 = vsyncpa [#allocation5], 1 }
 0x4e8   :  { %1567 = vsyncpa [#allocation5 + $0x1], 1 }
 0x4e9   :  { %1568 = vsyncpa [#allocation7], 1 }
 0x4ea   :  { %1570 = vsyncpa [#allocation7 + $0x1], 1 }
 0x4eb   :  { %1571 = vsyncpa [#allocation10], 1 }
 0x4ec   :  { %1573 = vsyncpa [#allocation10 + $0x1], 1 }
 0x4ed   :  { %1574 = vsyncpa [#allocation13], 1 }
 0x4ee   :  { %1576 = vsyncpa [#allocation13 + $0x1], 1 }

</bundles_post_ra>
